<compile_context>
chip_gen: v5e
topology: v5e:2x2
jax: 0.10.0
libtpu: 0.0.40
codegen_flags: <defaults>
</compile_context>

<pallas_src>
import math
import functools

import jax
import jax.numpy as jnp
from jax.experimental import pallas as pl
from jax.experimental.pallas import tpu as pltpu


def _round_up(x, m):
    return (x + m - 1) // m * m


def _arcface_kernel(emb_ref, wn_ref, label_ref, out_ref, *,
                    s, cos_m, sin_m, th, mm, easy_margin):
    j = pl.program_id(1)
    tn = out_ref.shape[1]

    # cosine = emb_norm @ weight_norm.T as an NT contraction on the last dim
    # of both tiles (no transpose); bf16 operands, f32 accumulation (MXU).
    cosine = jax.lax.dot_general(
        emb_ref[...], wn_ref[...],
        dimension_numbers=(((1,), (1,)), ((), ())),
        preferred_element_type=jnp.float32)                         # [tm, tn]

    # Margin math in f32 (VPU); sqrt via the EUP path.
    sine = jnp.sqrt(jnp.maximum(1.0 - cosine * cosine, 0.0))
    phi = cosine * cos_m - sine * sin_m
    if easy_margin:
        phi = jnp.where(cosine > 0.0, phi, cosine)
    else:
        phi = jnp.where(cosine > th, phi, cosine - mm)

    # one_hot.scatter_(1, label, 1): compare global column index vs label,
    # blend with a single select (no f32 one-hot materialization), fuse *s.
    col = j * tn + jax.lax.broadcasted_iota(jnp.int32, cosine.shape, 1)
    out_ref[...] = (jnp.where(col == label_ref[...], phi, cosine) * s
                    ).astype(out_ref.dtype)


def arc_margin_product(embeddings, weight, labels, *,
                       s=64.0, m=0.5, easy_margin=False):
    """ArcFace forward. embeddings: [B, D] f32, weight: [C, D] f32,
    labels: [B] int32 in [0, C). Returns [B, C] f32 logits."""
    B, D = embeddings.shape
    C, D2 = weight.shape
    assert D == D2
    # NOTE: labels are assumed valid in [0, C); an out-of-range label simply
    # gets no margin column (PyTorch's scatter_ would raise).

    # ---- MXU / lane-aligned tile sizes -------------------------------------
    D_pad = _round_up(D, 128)                 # K dim aligned to the MXU/lanes
    tm = min(256, _round_up(B, 8))            # batch tile (sublane multiple)
    tn = min(512, _round_up(C, 128))          # class tile (lane-dense output)
    B_pad = _round_up(B, tm)
    C_pad = _round_up(C, tn)

    # ---- wrapper-side prep (hoisted out of the per-tile hot path) ----------
    def _l2norm(x):
        x = x.astype(jnp.float32)
        inv = jax.lax.rsqrt(
            jnp.maximum(jnp.sum(x * x, axis=-1, keepdims=True), 1e-24))
        return x * inv

    wn = jnp.pad(_l2norm(weight),
                 ((0, C_pad - C), (0, D_pad - D))).astype(jnp.bfloat16)
    en = jnp.pad(_l2norm(embeddings),
                 ((0, B_pad - B), (0, D_pad - D))).astype(jnp.bfloat16)
    lab = jnp.pad(labels.astype(jnp.int32), (0, B_pad - B),
                  constant_values=-1).reshape(B_pad, 1)

    kernel = functools.partial(
        _arcface_kernel,
        s=float(s),
        cos_m=math.cos(m),
        sin_m=math.sin(m),
        th=math.cos(math.pi - m),
        mm=math.sin(math.pi - m) * m,
        easy_margin=easy_margin,
    )

    # Explicit VMEM budget: double-buffered tiles, 2x headroom, capped to stay
    # comfortably within v7x's 64 MiB physical VMEM.
    vmem_bytes = (2 * tn * D_pad * 2       # weight tiles (bf16)
                  + 2 * tm * D_pad * 2     # embedding tiles (bf16)
                  + 2 * tm * tn * 4        # output tiles (f32)
                  + 2 * tm * 128 * 4)      # label tiles (lane-padded i32)
    vmem_limit = int(min(max(2 * vmem_bytes, 4 << 20), 48 << 20))

    grid = (B_pad // tm, C_pad // tn)
    out = pl.pallas_call(
        kernel,
        out_shape=jax.ShapeDtypeStruct((B_pad, C_pad), jnp.float32),
        grid_spec=pltpu.PrefetchScalarGridSpec(
            num_scalar_prefetch=0,
            grid=grid,
            in_specs=[
                pl.BlockSpec((tm, D_pad), lambda i, j: (i, 0)),   # norm emb
                pl.BlockSpec((tn, D_pad), lambda i, j: (j, 0)),   # norm weight
                pl.BlockSpec((tm, 1), lambda i, j: (i, 0)),       # labels
            ],
            out_specs=pl.BlockSpec((tm, tn), lambda i, j: (i, j)),
        ),
        compiler_params=pltpu.CompilerParams(
            # No cross-iteration state -> both axes are safely parallel.
            dimension_semantics=("parallel", "parallel"),
            vmem_limit_bytes=vmem_limit,
        ),
    )(en, wn, lab)

    return out[:B, :C]


def _xavier_uniform(key, out_features, in_features):
    # Matches nn.init.xavier_uniform_ for a (out_features, in_features) weight.
    bound = math.sqrt(6.0 / (in_features + out_features))
    return jax.random.uniform(
        key, (out_features, in_features), dtype=jnp.float32,
        minval=-bound, maxval=bound)


if __name__ == "__main__":
    in_features = 32     # D
    out_features = 128   # C (number of classes)
    batch = 8            # B

    key = jax.random.PRNGKey(0)
    k_w, k_x, k_l = jax.random.split(key, 3)

    weight = _xavier_uniform(k_w, out_features, in_features)
    embeddings = jax.random.normal(k_x, (batch, in_features), dtype=jnp.float32)
    labels = jax.random.randint(k_l, (batch,), 0, out_features, dtype=jnp.int32)

    s_val, m_val = 64.0, 0.5
    out = arc_margin_product(embeddings, weight, labels,
                             s=s_val, m=m_val, easy_margin=False)
    jax.block_until_ready(out)

    # Pure-JAX f32 reference. The kernel uses bf16 MXU operands, so allow
    # ~1e-2 cosine-level error (scaled by s).
    def ref(emb, w, lab, s=64.0, m=0.5):
        en = emb / jnp.maximum(jnp.linalg.norm(emb, axis=1, keepdims=True), 1e-12)
        wn = w / jnp.maximum(jnp.linalg.norm(w, axis=1, keepdims=True), 1e-12)
        cos = en @ wn.T
        sin = jnp.sqrt(jnp.clip(1.0 - cos ** 2, 0.0, 1.0))
        phi = cos * math.cos(m) - sin * math.sin(m)
        phi = jnp.where(cos > math.cos(math.pi - m), phi,
                        cos - math.sin(math.pi - m) * m)
        oh = jax.nn.one_hot(lab, w.shape[0], dtype=jnp.float32)
        return (oh * phi + (1.0 - oh) * cos) * s

    expected = ref(embeddings, weight, labels, s=s_val, m=m_val)
    assert jnp.allclose(out, expected, atol=1e-2 * s_val, rtol=1e-2), \
        "mismatch vs reference"

    print("KERNEL_OK")
</pallas_src>

<mosaic_0001>
module attributes {stable_mosaic.version = 11 : i64} {
  func.func @_arcface_kernel(%arg0: i32, %arg1: i32, %arg2: memref<8x128xbf16, #tpu.memory_space<vmem>>, %arg3: memref<128x128xbf16, #tpu.memory_space<vmem>>, %arg4: memref<8x1xi32, #tpu.memory_space<vmem>>, %arg5: memref<8x128xf32, #tpu.memory_space<vmem>>) attributes {dimension_semantics = [#tpu.dimension_semantics<parallel>, #tpu.dimension_semantics<parallel>], iteration_bounds = array<i64: 1, 1>, scalar_prefetch = 0 : i64, scratch_operands = 0 : i64, tpu.core_type = #tpu.core_type<tc>, window_params = [{transform_indices = @transform_0, window_bounds = array<i64: 8, 128>}, {transform_indices = @transform_1, window_bounds = array<i64: 128, 128>}, {transform_indices = @transform_2, window_bounds = array<i64: 8, 1>}, {transform_indices = @transform_3, window_bounds = array<i64: 8, 128>}]} {
    %c0 = arith.constant 0 : index
    %c0_0 = arith.constant 0 : index
    %0 = vector.load %arg2[%c0, %c0_0] : memref<8x128xbf16, #tpu.memory_space<vmem>>, vector<8x128xbf16>
    %c0_1 = arith.constant 0 : index
    %c0_2 = arith.constant 0 : index
    %1 = vector.load %arg3[%c0_1, %c0_2] : memref<128x128xbf16, #tpu.memory_space<vmem>>, vector<128x128xbf16>
    %cst = arith.constant dense<0.000000e+00> : vector<8x128xf32>
    %2 = tpu.matmul %0, %1, %cst {dimension_numbers = #tpu.dot_dimension_numbers<[1], [1], [0], [0], [0, 0, 1, 0], [], []>} : vector<8x128xbf16>, vector<128x128xbf16>, vector<8x128xf32> -> vector<8x128xf32>
    %3 = arith.mulf %2, %2 : vector<8x128xf32>
    %cst_3 = arith.constant 1.000000e+00 : f32
    %4 = vector.broadcast %cst_3 : f32 to vector<8x128xf32>
    %5 = arith.subf %4, %3 : vector<8x128xf32>
    %cst_4 = arith.constant 0.000000e+00 : f32
    %6 = vector.broadcast %cst_4 : f32 to vector<8x128xf32>
    %7 = arith.maximumf %5, %6 : vector<8x128xf32>
    %8 = math.sqrt %7 : vector<8x128xf32>
    %cst_5 = arith.constant 0.87758255 : f32
    %9 = vector.broadcast %cst_5 : f32 to vector<8x128xf32>
    %10 = arith.mulf %2, %9 : vector<8x128xf32>
    %cst_6 = arith.constant 0.47942555 : f32
    %11 = vector.broadcast %cst_6 : f32 to vector<8x128xf32>
    %12 = arith.mulf %8, %11 : vector<8x128xf32>
    %13 = arith.subf %10, %12 : vector<8x128xf32>
    %cst_7 = arith.constant -0.87758255 : f32
    %14 = vector.broadcast %cst_7 : f32 to vector<8x128xf32>
    %15 = arith.cmpf ogt, %2, %14 : vector<8x128xf32>
    %cst_8 = arith.constant 0.239712775 : f32
    %16 = vector.broadcast %cst_8 : f32 to vector<8x128xf32>
    %17 = arith.subf %2, %16 : vector<8x128xf32>
    %18 = arith.select %15, %13, %17 : vector<8x128xi1>, vector<8x128xf32>
    %c128_i32 = arith.constant 128 : i32
    %19 = arith.muli %arg1, %c128_i32 : i32
    %20 = tpu.iota {dimensions = array<i32: 1>} : vector<8x128xi32>
    %21 = vector.broadcast %19 : i32 to vector<8x128xi32>
    %22 = arith.addi %21, %20 : vector<8x128xi32>
    %c0_9 = arith.constant 0 : index
    %c0_10 = arith.constant 0 : index
    %23 = vector.load %arg4[%c0_9, %c0_10] : memref<8x1xi32, #tpu.memory_space<vmem>>, vector<8x1xi32>
    %24 = vector.broadcast %23 : vector<8x1xi32> to vector<8x128xi32>
    %25 = arith.cmpi eq, %22, %24 : vector<8x128xi32>
    %26 = arith.select %25, %18, %2 : vector<8x128xi1>, vector<8x128xf32>
    %cst_11 = arith.constant 6.400000e+01 : f32
    %27 = vector.broadcast %cst_11 : f32 to vector<8x128xf32>
    %28 = arith.mulf %26, %27 : vector<8x128xf32>
    %c0_12 = arith.constant 0 : index
    %c0_13 = arith.constant 0 : index
    %29 = vector.load %arg5[%c0_12, %c0_13] : memref<8x128xf32, #tpu.memory_space<vmem>>, vector<8x128xf32>
    tpu.vector_store %arg5[%c0_12, %c0_13], %28 {strides = array<i32>} : memref<8x128xf32, #tpu.memory_space<vmem>>, vector<8x128xf32>,
    return
  }
  func.func @transform_0(%arg0: i32, %arg1: i32) -> (i32, i32) {
    %c0_i32 = arith.constant 0 : i32
    %c0_i32_0 = arith.constant 0 : i32
    return %arg0, %c0_i32 : i32, i32
  }
  func.func @transform_1(%arg0: i32, %arg1: i32) -> (i32, i32) {
    %c0_i32 = arith.constant 0 : i32
    %c0_i32_0 = arith.constant 0 : i32
    return %arg1, %c0_i32 : i32, i32
  }
  func.func @transform_2(%arg0: i32, %arg1: i32) -> (i32, i32) {
    %c0_i32 = arith.constant 0 : i32
    %c0_i32_0 = arith.constant 0 : i32
    return %arg0, %c0_i32 : i32, i32
  }
  func.func @transform_3(%arg0: i32, %arg1: i32) -> (i32, i32) {
    %c0_i32 = arith.constant 0 : i32
    return %arg0, %arg1 : i32, i32
  }
}

</mosaic_0001>

<bundles_post_ra>
// kernel: tpu_custom_call.1
= control target key start
LH: loop header
LB: loop body
LE: loop exit
PB: predicated region body
PF: predicated region fallthrough
CT: control target
= control target key end

     0   :  { %8 = vsyncpa [#allocation3], 0  ;;  %s298_s0 = inlined_call_operand.vmem [shape: bf16[8,128], index: 0, kind: input, shape index: {}]   ;;  %s299_s1 = inlined_call_operand.hbm [shape: bf16[128,128], index: 1, kind: input, shape index: {}]   ;;  %s300_s2 = inlined_call_operand.vmem [shape: s32[8,1], index: 2, kind: input, shape index: {}]   ;;  %s301_s3 = inlined_call_operand.hbm [shape: f32[8,128], index: 3, kind: output, shape index: {}]  }
   0x1   :  { %9 = vsyncpa [#allocation4], 0  ;;  %s16_s14 = sshll.u32 %s299_s1, 4  ;;  %s261_s15 = smov [#allocation2]   ;;  %s17_s14 = int_to_ptr.hbm [resolvable:$true] %s16_s14 }
   0x2   :  { %s18_s16 = sshll.u32 %s261_s15, 4  ;;  %s262_s17 = smov 64   ;;  %s19_s16 = int_to_ptr.vmem [resolvable:$true] %s18_s16 }
   0x3   :  { %s263_s18 = smov 4  }
   0x4   :  { %24 = dma.hbm_to_vmem [thread:$0]  %s17_s14, 1024, %s19_s16, [#allocation3], %s262_s17, %s262_s17, %s263_s18  }
   0x5   :  { %257 = dma.done.wait [#allocation3], 1024  }
   0x6   :  { %258 = vsyncadd [#allocation3], 4294966272  ;;  %v200_v0 = vld [vmem:[#allocation2 + $0x38] sm:$0xff]  ;;  %v199_v1 = vld [vmem:[#allocation2 + $0x30] sm:$0xff]  ;;  %v264_v6 = vmov 0   ;;  %v131_v21 = vlaneseq  ;;  %s150_s24 = sshll.u32 %s301_s3, 4  ;;  %s151_s24 = int_to_ptr.hbm [resolvable:$true] %s150_s24 }
   0x7   :  { %96 = vmatpush.bf16.xpose.msra.mxu0 %v200_v0  ;;  %v198_v2 = vld [vmem:[#allocation2 + $0x28] sm:$0xff]  ;;  %v197_v3 = vld [vmem:[#allocation2 + $0x20] sm:$0xff]  ;;  %v196_v4 = vld [vmem:[#allocation2 + $0x18] sm:$0xff]  ;;  %206 = vset.pattern.permute.xlu0 %v264_v6 }
   0x8   :  { %v135_v5 = vld [vmem:[%s300_s2] sm:$0xff]  ;;  %v195_v7 = vld [vmem:[#allocation2 + $0x10] sm:$0xff]  ;;  %v194_v8 = vld [vmem:[#allocation2 + $0x8] sm:$0xff]  ;;  %v132_v25 = vand.u32 127, %v131_v21 }
   0x9   :  { %137 = vperm.xlu0 %206, %v135_v5   ;;  %v193_v9 = vld [vmem:[#allocation2] sm:$0xff] }
   0xa   :  { %v31_v10 = vld [vmem:[%s298_s0] sm:$0xf]  ;;  %s265_s0 = smov [#allocation5]  }
   0xb   :  { %s148_s2 = sshll.u32 %s265_s0, 4  ;;  %s149_s2 = int_to_ptr.vmem [resolvable:$true] %s148_s2 }
   0xf   :  { %97 = vmatpush.bf16.xpose.msra.mxu0 %v199_v1 }
  0x17   :  { %98 = vmatpush.bf16.xpose.msra.mxu0 %v198_v2 }
  0x1f   :  { %99 = vmatpush.bf16.xpose.msra.mxu0 %v197_v3 }
  0x27   :  { %100 = vmatpush.bf16.xpose.msra.mxu0 %v196_v4 }
  0x2f   :  { %101 = vmatpush.bf16.xpose.msra.mxu0 %v195_v7 }
  0x37   :  { %102 = vmatpush.bf16.xpose.msra.mxu0 %v194_v8 }
  0x3f   :  { %103 = vmatpush.bf16.xpose.msra.mxu0 %v193_v9 }
  0x46   :  { %104 = vmatmul.bf16.vlgmr.msra.gmra.mxu0 %v31_v10 }
  0x7b   :  { %v138_v27 = vpop.permute.xlu0 %137 }
  0x7c   :  { %vm139_vm2 = vcmp.eq.s32.totalorder %v132_v25, %v138_v27 }
  0xc3   :  { %v105_v11 = vpop.f32.mrf.mxu0 }
  0xc4   :  { %v109_v12 = vmul.f32 %v105_v11, %v105_v11  ;;  %v124_v29 = vmul.f32 0.87758255, %v105_v11  ;;  %v192_v31 = vadd.f32 -0.23971277, %v105_v11  ;;  %vm127_vm3 = vcmp.gt.f32.partialorder %v105_v11, -0.87758255 }
  0xc6   :  { %v110_v13 = vsub.f32 1.0, %v109_v12 }
  0xc8   :  { %v111_v14 = vmax.f32 %v110_v13, 0.0 }
  0xca   :  { %207 = vrsqrt.f32 %v111_v14  ;;  %vm119_vm0 = vcmp.eq.f32.partialorder %v111_v14, inf  ;;  %v122_v24 = vand.u32 2147483648, %v111_v14  ;;  %vm121_vm1 = vcmp.eq.f32.partialorder %v111_v14, 0.0 }
  0xcb   :  { %v107_v15 = vpop.f32.mrf.mxu0 }
  0xd0   :  { %v208_v16 = vpop.eup %207 }
  0xd1   :  { %v113_v17 = vmul.f32 %v208_v16, %v111_v14 }
  0xd3   :  { %v114_v18 = vmul.f32 %v208_v16, %v113_v17 }
  0xd5   :  { %v115_v19 = vmul.f32 0.5, %v114_v18 }
  0xd7   :  { %v116_v20 = vsub.f32 1.5, %v115_v19 }
  0xd9   :  { %v117_v22 = vmul.f32 %v208_v16, %v116_v20 }
  0xdb   :  { %v118_v23 = vmul.f32 %v117_v22, %v111_v14 }
  0xdd   :  { %v120_v26 = vsel %vm119_vm0, %v111_v14, %v118_v23 }
  0xde   :  { %v123_v28 = vsel %vm121_vm1, %v122_v24, %v120_v26 }
  0xdf   :  { %v125_v30 = vmul.f32 0.47942555, %v123_v28 }
  0xe1   :  { %v126_v32 = vsub.f32 %v124_v29, %v125_v30 }
  0xe3   :  { %v129_v33 = vsel %vm127_vm3, %v126_v32, %v192_v31 }
  0xe4   :  { %v140_v34 = vsel %vm139_vm2, %v129_v33, %v105_v11 }
  0xe5   :  { %v141_v35 = vmul.f32 64.0, %v140_v34 }
  0xe7   :  { %142 = vst [vmem:[#allocation5] sm:$0xff] %v141_v35 }
  0xe8   :  { %153 = dma.vmem_to_hbm [thread:$0]  %s149_s2, 128, %s151_s24, [#allocation4]  }
  0xe9   :  { %259 = dma.done.wait [#allocation4], 128  }
  0xea   :  { %260 = vsyncadd [#allocation4], 4294967168 }
  0xeb   :  { %158 = vsyncpa [#allocation3], 1 }
  0xec   :  { %159 = vsyncpa [#allocation4], 1 }

</bundles_post_ra>
